<compile_context>
chip_gen: v7x
topology: tpu7x:2x2x1
jax: 0.10.0
libtpu: 0.0.40
codegen_flags: <defaults>
</compile_context>

<pallas_src>
import functools

import jax
import jax.numpy as jnp
from jax import lax
from jax.experimental import pallas as pl
from jax.experimental.pallas import tpu as pltpu


def _round_up(x, m):
    return ((x + m - 1) // m) * m


# ----------------------------- Pallas kernel --------------------------------


def _tri_attn_kernel(e0_ref, e1_ref, e2_ref, g_ref, wv_ref, o_ref, *,
                     mix_dtype, approx_recip):
    """Fused triplanar softmax attention for one (batch, spatial-tile) block.

    e*_ref : (C_in, TM)   planar embeddings, compute dtype (bf16 or f32)
    g_ref  : (Rg, C_in)   compute dtype, zero-row-padded  G = scale * Wk^T @ Wq
    wv_ref : (Rv, C_in)   compute dtype, zero-row-padded value weight
    o_ref  : (C_out, TM)  output dtype (bf16 or f32)
    """
    c_in = e0_ref.shape[0]
    c_out = o_ref.shape[0]

    g = g_ref[...]                              # (Rg, C_in)
    wv = wv_ref[...].astype(mix_dtype)          # (Rv, C_in)

    # Load (and keep) each embedding tile exactly once.
    e0 = e0_ref[...]
    e1 = e1_ref[...]
    e2 = e2_ref[...]

    def logit(e):
        # MXU consumes the embedding tile in its native (bf16) dtype, f32 accumulate.
        ge = jnp.dot(g, e, preferred_element_type=jnp.float32)          # (Rg, TM)
        # per-column quadratic form: e^T G e == scale * sum_c (Wk e)*(Wq e)
        return jnp.sum(ge[:c_in, :] * e.astype(jnp.float32),
                       axis=0, keepdims=True)                           # (1, TM)

    # Pack the three per-plane logits into one (3, TM) slab: one max/sub/exp/recip
    # pass at 3x sublane occupancy instead of three 1/8-occupancy passes.
    a = jnp.concatenate([logit(e0), logit(e1), logit(e2)], axis=0)      # (3, TM) f32
    mx = jnp.max(a, axis=0, keepdims=True)                              # (1, TM)
    p = jnp.exp(a - mx)                                                 # (3, TM)
    denom = jnp.sum(p, axis=0, keepdims=True)                           # (1, TM)
    if approx_recip:
        w = p * pl.reciprocal(denom, approx=True)                       # EUP slot
    else:
        w = p / denom                                                   # exact path
    w0 = w[0:1, :].astype(mix_dtype)
    w1 = w[1:2, :].astype(mix_dtype)
    w2 = w[2:3, :].astype(mix_dtype)

    # Softmax weighting commutes with the bias-free value projection:
    #   out = Wv @ (w0*e0 + w1*e1 + w2*e2)   -> a single value matmul per tile.
    e_mix = (w0 * e0.astype(mix_dtype)
             + w1 * e1.astype(mix_dtype)
             + w2 * e2.astype(mix_dtype))                               # (C_in, TM)
    out = jnp.dot(wv, e_mix, preferred_element_type=jnp.float32)        # (Rv, TM)
    o_ref[...] = out[:c_out, :].astype(o_ref.dtype)


# --------------------------- tiling / dtype policy ---------------------------


def _default_mix_dtype(compute_dtype):
    """bf16 VPU math only on parts with native bf16 VALUs (v6e/v7x); keep the
    softmax-weighted mix in f32 on v5e and older (they are HBM-bound anyway)."""
    if compute_dtype == jnp.dtype(jnp.float32):
        return jnp.dtype(jnp.float32)
    try:
        kind = jax.devices()[0].device_kind.lower()
    except Exception:  # no device visible at trace time
        kind = ""
    if any(v in kind for v in ("v2", "v3", "v4", "v5")):
        return jnp.dtype(jnp.float32)
    return compute_dtype


def _choose_tile(m, n_batch, tm_max, itemsize, c_in, c_out, *,
                 vmem_budget=8 * 1024 * 1024, min_tile=1024, min_steps=4):
    """Pick the largest lane-dense (multiple-of-128) spatial tile that keeps the
    double-buffered working set within a few MiB, shrinking only if the parallel
    grid would otherwise be too small to occupy both TensorCores (megacore/v7x)."""
    # rough per-column bytes: double-buffered IO (3 planes in + out) + f32 intermediates
    per_col = (6 * c_in + 2 * c_out) * itemsize + (2 * c_in + 8) * 4
    budget_tm = max(min_tile, (vmem_budget // per_col) // 128 * 128)
    tm_cap = max(128, min(tm_max, budget_tm) // 128 * 128)
    tm = min(tm_cap, _round_up(m, 128))
    while tm > min_tile and n_batch * pl.cdiv(m, tm) < min_steps:
        tm = max(min_tile, (tm // 2) // 128 * 128)
    return tm


# ------------------------------ fused attention ------------------------------


def triplanar_attention_core(e0, e1, e2, wk, wq, wv, *, tm_max=16384,
                             compute_dtype=jnp.bfloat16, out_dtype=None,
                             mix_dtype=None):
    """e_i: (N, C_in, M) planar embeddings; wk/wq/wv: (C_out, C_in).
    Returns (N, C_out, M) in out_dtype (defaults to compute_dtype)."""
    n, c_in, m = e0.shape
    c_out = wk.shape[0]
    compute_dtype = jnp.dtype(compute_dtype)
    out_dtype = jnp.dtype(out_dtype) if out_dtype is not None else compute_dtype
    if mix_dtype is None:
        mix_dtype = _default_mix_dtype(compute_dtype)
    mix_dtype = jnp.dtype(mix_dtype)

    # Fold key/query into the tiny Gram matrix G = scale * Wk^T @ Wq (f32), then hand
    # the kernel compute_dtype copies so the MXU eats bf16 operands directly.
    scale = jnp.float32(c_out) ** -0.5
    g = scale * (wk.astype(jnp.float32).T @ wq.astype(jnp.float32))     # (C_in, C_in)

    sub = 16 if compute_dtype.itemsize == 2 else 8                      # bf16 sublane packing
    rg = _round_up(max(c_in, sub), sub)
    rv = _round_up(max(c_out, sub), sub)
    g_p = jnp.zeros((rg, c_in), compute_dtype).at[:c_in, :].set(g.astype(compute_dtype))
    wv_p = jnp.zeros((rv, c_in), compute_dtype).at[:c_out, :].set(wv.astype(compute_dtype))

    # Embeddings normally arrive already in compute_dtype (cast fused into the conv
    # epilogue by the caller); this is a no-op in that case.
    e0, e1, e2 = (e.astype(compute_dtype) for e in (e0, e1, e2))

    tm = _choose_tile(m, n, tm_max, compute_dtype.itemsize, c_in, c_out)
    # Ragged spatial tail handled by masked partial blocks — no jnp.pad HBM copy.
    grid = (n, pl.cdiv(m, tm))

    e_spec = pl.BlockSpec((None, c_in, tm), lambda b, i: (b, 0, i))
    g_spec = pl.BlockSpec((rg, c_in), lambda b, i: (0, 0))
    v_spec = pl.BlockSpec((rv, c_in), lambda b, i: (0, 0))
    o_spec = pl.BlockSpec((None, c_out, tm), lambda b, i: (b, 0, i))

    kernel = functools.partial(
        _tri_attn_kernel,
        mix_dtype=mix_dtype,
        approx_recip=(compute_dtype != jnp.dtype(jnp.float32)),
    )

    out = pl.pallas_call(
        kernel,
        out_shape=jax.ShapeDtypeStruct((n, c_out, m), out_dtype),
        grid_spec=pltpu.PrefetchScalarGridSpec(
            num_scalar_prefetch=0,
            grid=grid,
            in_specs=[e_spec, e_spec, e_spec, g_spec, v_spec],
            out_specs=o_spec,
        ),
        compiler_params=pltpu.CompilerParams(
            dimension_semantics=("parallel", "parallel"),
            vmem_limit_bytes=32 * 1024 * 1024,
        ),
    )(e0, e1, e2, g_p, wv_p)
    return out


# --------------------------- embedding convolutions --------------------------


def _depthwise_conv3d(x, w, b, stride, padding, dilation):
    """PyTorch-style grouped (depthwise) Conv3d. x: (N,C,D,H,W), w: (C,1,kD,kH,kW)."""
    out = lax.conv_general_dilated(
        x,
        w,
        window_strides=stride,
        padding=[(p, p) for p in padding],
        rhs_dilation=dilation,
        feature_group_count=x.shape[1],
        dimension_numbers=("NCDHW", "OIDHW", "NCDHW"),
    )
    if b is not None:
        out = out + b[None, :, None, None, None]
    return out


def _factorized_conv_cfgs(kernel_size, stride, padding, dilation):
    """Per-plane, per-layer factorised kernel/stride/padding/dilation tuples from
    TriplanarAttentionLayer.__init__ (tr_flag=False)."""
    k, s, p, d = kernel_size, stride, padding, dilation

    def cfg(mask):
        return dict(
            kernel=tuple(k if m else 1 for m in mask),
            stride=tuple(s if m else 1 for m in mask),
            padding=tuple(p if m else 0 for m in mask),
            dilation=tuple(d if m else 1 for m in mask),
        )

    return [
        [cfg((0, 1, 1)), cfg((1, 0, 0))],  # plane 0: (1,k,k) then (k,1,1)
        [cfg((1, 0, 1)), cfg((0, 1, 0))],  # plane 1: (k,1,k) then (1,k,1)
        [cfg((1, 1, 0)), cfg((0, 0, 1))],  # plane 2: (k,k,1) then (1,1,k)
    ]
# TODO(synk): tr_flag=True (ConvTranspose3d embeddings) not implemented; only the default Conv3d path.


def init_params(key, in_channels, out_channels, kernel_size, stride=1, padding=0,
                dilation=1, bias=True):
    """Deterministic synthetic init matching the PyTorch module's parameter shapes."""
    cfgs = _factorized_conv_cfgs(kernel_size, stride, padding, dilation)
    keys = iter(jax.random.split(key, 16))

    emb = []
    for plane in range(3):
        layers = []
        for layer in range(2):
            c = cfgs[plane][layer]
            kd, kh, kw = c["kernel"]
            fan_in = kd * kh * kw  # depthwise: 1 input channel per group
            bound = 1.0 / (fan_in ** 0.5)
            w = jax.random.uniform(next(keys), (in_channels, 1, kd, kh, kw),
                                   jnp.float32, -bound, bound)
            b = (jax.random.uniform(next(keys), (in_channels,), jnp.float32, -bound, bound)
                 if bias else None)
            layers.append(dict(w=w, b=b, **c))
        emb.append(layers)

    bound = 1.0 / (in_channels ** 0.5)
    wk = jax.random.uniform(next(keys), (out_channels, in_channels), jnp.float32, -bound, bound)
    wq = jax.random.uniform(next(keys), (out_channels, in_channels), jnp.float32, -bound, bound)
    wv = jax.random.uniform(next(keys), (out_channels, in_channels), jnp.float32, -bound, bound)
    return dict(emb=emb, wk=wk, wq=wq, wv=wv)


# ------------------------------- forward pass --------------------------------


def _compute_embeddings(x, params, out_dtype=None):
    embeddings = []
    for layers in params["emb"]:
        e = x
        for layer in layers:
            e = _depthwise_conv3d(e, layer["w"], layer["b"],
                                  layer["stride"], layer["padding"], layer["dilation"])
        if out_dtype is not None:
            # Emit compute_dtype straight from the conv epilogue so the cast fuses
            # under jit instead of becoming a separate full HBM read/write pass.
            e = e.astype(out_dtype)
        embeddings.append(e)
    return embeddings


def triplanar_attention_layer(x, params, *, tm_max=16384,
                              compute_dtype=jnp.bfloat16, out_dtype=None):
    """x: (N, C_in, D, H, W) -> (N, C_out, D_out, H_out, W_out) in out_dtype
    (defaults to compute_dtype)."""
    n = x.shape[0]
    embeddings = _compute_embeddings(x, params, out_dtype=compute_dtype)
    c_in = embeddings[0].shape[1]
    do, ho, wo = embeddings[0].shape[2:]
    m = do * ho * wo

    # (N, C, D, H, W) -> (N, C, D*H*W): contiguous reshape, no transpose copies.
    flat = [e.reshape(n, c_in, m) for e in embeddings]
    out = triplanar_attention_core(flat[0], flat[1], flat[2],
                                   params["wk"], params["wq"], params["wv"],
                                   tm_max=tm_max, compute_dtype=compute_dtype,
                                   out_dtype=out_dtype)
    c_out = params["wk"].shape[0]
    return out.reshape(n, c_out, do, ho, wo)


def _reference_forward(x, params):
    """Pure-JAX reference mirroring the PyTorch forward (for sanity checking)."""
    embeddings = _compute_embeddings(x, params)
    wk, wq, wv = params["wk"], params["wq"], params["wv"]
    c_out = wk.shape[0]
    ks = [jnp.einsum("oc,ncdhw->nodhw", wk, e) for e in embeddings]
    qs = [jnp.einsum("oc,ncdhw->nodhw", wq, e) for e in embeddings]
    vs = [jnp.einsum("oc,ncdhw->nodhw", wv, e) for e in embeddings]
    atts = [c_out ** -0.5 * jnp.sum(k * q, axis=1, keepdims=True) for k, q in zip(ks, qs)]
    att = jax.nn.softmax(jnp.stack(atts, axis=5), axis=5)
    val = jnp.stack(vs, axis=5)
    return jnp.sum(att * val, axis=5)


# ---------------------------------- main --------------------------------------


if __name__ == "__main__":
    key = jax.random.PRNGKey(0)
    kp, kx = jax.random.split(key)

    in_channels, out_channels = 4, 8
    params = init_params(kp, in_channels, out_channels,
                         kernel_size=3, stride=1, padding=1, dilation=1, bias=True)

    # (N, C_in, D, H, W) = (2, 4, 4, 8, 8) -> per-batch M = 4*8*8 = 256 spatial positions
    x = jax.random.normal(kx, (2, in_channels, 4, 8, 8), jnp.float32)

    y_ref = jax.block_until_ready(_reference_forward(x, params))

    # Full-precision path: exact softmax division; only the Gram-matrix reassociation
    # and MXU f32 matmul rounding differ from the reference.
    fwd_f32 = jax.jit(functools.partial(triplanar_attention_layer, params=params,
                                        compute_dtype=jnp.float32))
    y32 = jax.block_until_ready(fwd_f32(x))
    assert y32.shape == (2, out_channels, 4, 8, 8), y32.shape
    assert y32.dtype == jnp.dtype(jnp.float32), y32.dtype
    err32 = float(jnp.max(jnp.abs(y32 - y_ref)))
    assert jnp.allclose(y32, y_ref, atol=5e-3, rtol=5e-3), err32

    # Bandwidth-optimized default path: bf16 input/output HBM streams, bf16 MXU
    # operands, f32 accumulation in-kernel, chip-gated bf16 softmax mix.
    fwd_bf16 = jax.jit(functools.partial(triplanar_attention_layer, params=params))
    y16 = jax.block_until_ready(fwd_bf16(x))
    assert y16.dtype == jnp.dtype(jnp.bfloat16), y16.dtype
    y16_f = y16.astype(jnp.float32)
    err16 = float(jnp.max(jnp.abs(y16_f - y_ref)))
    assert jnp.allclose(y16_f, y_ref, atol=4e-2, rtol=4e-2), err16

    print("KERNEL_OK")
</pallas_src>

<mosaic_0001>
module attributes {stable_mosaic.version = 11 : i64} {
  func.func @_tri_attn_kernel(%arg0: i32, %arg1: i32, %arg2: memref<1x4x256xf32, #tpu.memory_space<vmem>>, %arg3: memref<1x4x256xf32, #tpu.memory_space<vmem>>, %arg4: memref<1x4x256xf32, #tpu.memory_space<vmem>>, %arg5: memref<8x4xf32, #tpu.memory_space<vmem>>, %arg6: memref<8x4xf32, #tpu.memory_space<vmem>>, %arg7: memref<1x8x256xf32, #tpu.memory_space<vmem>>) attributes {dimension_semantics = [#tpu.dimension_semantics<parallel>, #tpu.dimension_semantics<parallel>], iteration_bounds = array<i64: 2, 1>, scalar_prefetch = 0 : i64, scratch_operands = 0 : i64, tpu.core_type = #tpu.core_type<tc>, window_params = [{transform_indices = @transform_0, window_bounds = array<i64: 1, 4, 256>}, {transform_indices = @transform_1, window_bounds = array<i64: 1, 4, 256>}, {transform_indices = @transform_2, window_bounds = array<i64: 1, 4, 256>}, {pipeline_mode = #tpu.pipeline_mode<synchronous>, transform_indices = @transform_3, window_bounds = array<i64: 8, 4>}, {pipeline_mode = #tpu.pipeline_mode<synchronous>, transform_indices = @transform_4, window_bounds = array<i64: 8, 4>}, {transform_indices = @transform_5, window_bounds = array<i64: 1, 8, 256>}]} {
    %c0 = arith.constant 0 : index
    %c0_0 = arith.constant 0 : index
    %0 = vector.load %arg5[%c0, %c0_0] : memref<8x4xf32, #tpu.memory_space<vmem>>, vector<8x4xf32>
    %c0_1 = arith.constant 0 : index
    %c0_2 = arith.constant 0 : index
    %1 = vector.load %arg6[%c0_1, %c0_2] : memref<8x4xf32, #tpu.memory_space<vmem>>, vector<8x4xf32>
    %c0_3 = arith.constant 0 : index
    %c0_4 = arith.constant 0 : index
    %c0_5 = arith.constant 0 : index
    %2 = vector.load %arg2[%c0_3, %c0_4, %c0_5] : memref<1x4x256xf32, #tpu.memory_space<vmem>>, vector<1x4x256xf32>
    %3 = vector.shape_cast %2 : vector<1x4x256xf32> to vector<4x256xf32>
    %c0_6 = arith.constant 0 : index
    %c0_7 = arith.constant 0 : index
    %c0_8 = arith.constant 0 : index
    %4 = vector.load %arg3[%c0_6, %c0_7, %c0_8] : memref<1x4x256xf32, #tpu.memory_space<vmem>>, vector<1x4x256xf32>
    %5 = vector.shape_cast %4 : vector<1x4x256xf32> to vector<4x256xf32>
    %c0_9 = arith.constant 0 : index
    %c0_10 = arith.constant 0 : index
    %c0_11 = arith.constant 0 : index
    %6 = vector.load %arg4[%c0_9, %c0_10, %c0_11] : memref<1x4x256xf32, #tpu.memory_space<vmem>>, vector<1x4x256xf32>
    %7 = vector.shape_cast %6 : vector<1x4x256xf32> to vector<4x256xf32>
    %cst = arith.constant dense<0.000000e+00> : vector<8x256xf32>
    %8 = tpu.matmul %0, %3, %cst {dimension_numbers = #tpu.dot_dimension_numbers<[1], [0], [0], [1], [0, 0, 1, 1], [], []>} : vector<8x4xf32>, vector<4x256xf32>, vector<8x256xf32> -> vector<8x256xf32>
    %9 = vector.extract_strided_slice %8 {offsets = [0, 0], sizes = [4, 256], strides = [1, 1]} : vector<8x256xf32> to vector<4x256xf32>
    %10 = arith.mulf %9, %3 : vector<4x256xf32>
    %cst_12 = arith.constant dense<0.000000e+00> : vector<256xf32>
    %11 = vector.multi_reduction <add>, %10, %cst_12 [0] : vector<4x256xf32> to vector<256xf32>
    %12 = vector.shape_cast %11 : vector<256xf32> to vector<1x256xf32>
    %cst_13 = arith.constant dense<0.000000e+00> : vector<8x256xf32>
    %13 = tpu.matmul %0, %5, %cst_13 {dimension_numbers = #tpu.dot_dimension_numbers<[1], [0], [0], [1], [0, 0, 1, 1], [], []>} : vector<8x4xf32>, vector<4x256xf32>, vector<8x256xf32> -> vector<8x256xf32>
    %14 = vector.extract_strided_slice %13 {offsets = [0, 0], sizes = [4, 256], strides = [1, 1]} : vector<8x256xf32> to vector<4x256xf32>
    %15 = arith.mulf %14, %5 : vector<4x256xf32>
    %cst_14 = arith.constant dense<0.000000e+00> : vector<256xf32>
    %16 = vector.multi_reduction <add>, %15, %cst_14 [0] : vector<4x256xf32> to vector<256xf32>
    %17 = vector.shape_cast %16 : vector<256xf32> to vector<1x256xf32>
    %cst_15 = arith.constant dense<0.000000e+00> : vector<8x256xf32>
    %18 = tpu.matmul %0, %7, %cst_15 {dimension_numbers = #tpu.dot_dimension_numbers<[1], [0], [0], [1], [0, 0, 1, 1], [], []>} : vector<8x4xf32>, vector<4x256xf32>, vector<8x256xf32> -> vector<8x256xf32>
    %19 = vector.extract_strided_slice %18 {offsets = [0, 0], sizes = [4, 256], strides = [1, 1]} : vector<8x256xf32> to vector<4x256xf32>
    %20 = arith.mulf %19, %7 : vector<4x256xf32>
    %cst_16 = arith.constant dense<0.000000e+00> : vector<256xf32>
    %21 = vector.multi_reduction <add>, %20, %cst_16 [0] : vector<4x256xf32> to vector<256xf32>
    %22 = vector.shape_cast %21 : vector<256xf32> to vector<1x256xf32>
    %23 = tpu.concatenate %12, %17, %22 in 0 : vector<1x256xf32>, vector<1x256xf32>, vector<1x256xf32> -> vector<3x256xf32>
    %cst_17 = arith.constant dense<0xFF800000> : vector<256xf32>
    %24 = vector.multi_reduction <maximumf>, %23, %cst_17 [0] : vector<3x256xf32> to vector<256xf32>
    %25 = vector.shape_cast %24 : vector<256xf32> to vector<1x256xf32>
    %26 = vector.broadcast %25 : vector<1x256xf32> to vector<3x256xf32>
    %27 = arith.subf %23, %26 : vector<3x256xf32>
    %28 = math.exp %27 : vector<3x256xf32>
    %cst_18 = arith.constant dense<0.000000e+00> : vector<256xf32>
    %29 = vector.multi_reduction <add>, %28, %cst_18 [0] : vector<3x256xf32> to vector<256xf32>
    %30 = vector.shape_cast %29 : vector<256xf32> to vector<1x256xf32>
    %31 = vector.broadcast %30 : vector<1x256xf32> to vector<3x256xf32>
    %32 = arith.divf %28, %31 : vector<3x256xf32>
    %33 = vector.extract_strided_slice %32 {offsets = [0, 0], sizes = [1, 256], strides = [1, 1]} : vector<3x256xf32> to vector<1x256xf32>
    %34 = vector.extract_strided_slice %32 {offsets = [1, 0], sizes = [1, 256], strides = [1, 1]} : vector<3x256xf32> to vector<1x256xf32>
    %35 = vector.extract_strided_slice %32 {offsets = [2, 0], sizes = [1, 256], strides = [1, 1]} : vector<3x256xf32> to vector<1x256xf32>
    %36 = vector.broadcast %33 : vector<1x256xf32> to vector<4x256xf32>
    %37 = arith.mulf %36, %3 : vector<4x256xf32>
    %38 = vector.broadcast %34 : vector<1x256xf32> to vector<4x256xf32>
    %39 = arith.mulf %38, %5 : vector<4x256xf32>
    %40 = arith.addf %37, %39 : vector<4x256xf32>
    %41 = vector.broadcast %35 : vector<1x256xf32> to vector<4x256xf32>
    %42 = arith.mulf %41, %7 : vector<4x256xf32>
    %43 = arith.addf %40, %42 : vector<4x256xf32>
    %cst_19 = arith.constant dense<0.000000e+00> : vector<8x256xf32>
    %44 = tpu.matmul %1, %43, %cst_19 {dimension_numbers = #tpu.dot_dimension_numbers<[1], [0], [0], [1], [0, 0, 1, 1], [], []>} : vector<8x4xf32>, vector<4x256xf32>, vector<8x256xf32> -> vector<8x256xf32>
    %c0_20 = arith.constant 0 : index
    %c0_21 = arith.constant 0 : index
    %c0_22 = arith.constant 0 : index
    %45 = vector.load %arg7[%c0_20, %c0_21, %c0_22] : memref<1x8x256xf32, #tpu.memory_space<vmem>>, vector<1x8x256xf32>
    %46 = vector.shape_cast %45 : vector<1x8x256xf32> to vector<8x256xf32>
    %47 = vector.shape_cast %44 : vector<8x256xf32> to vector<1x8x256xf32>
    tpu.vector_store %arg7[%c0_20, %c0_21, %c0_22], %47 {strides = array<i32>} : memref<1x8x256xf32, #tpu.memory_space<vmem>>, vector<1x8x256xf32>,
    return
  }
  func.func @transform_0(%arg0: i32, %arg1: i32) -> (i32, i32, i32) {
    %c0_i32 = arith.constant 0 : i32
    %c0_i32_0 = arith.constant 0 : i32
    return %arg0, %c0_i32, %arg1 : i32, i32, i32
  }
  func.func @transform_1(%arg0: i32, %arg1: i32) -> (i32, i32, i32) {
    %c0_i32 = arith.constant 0 : i32
    %c0_i32_0 = arith.constant 0 : i32
    return %arg0, %c0_i32, %arg1 : i32, i32, i32
  }
  func.func @transform_2(%arg0: i32, %arg1: i32) -> (i32, i32, i32) {
    %c0_i32 = arith.constant 0 : i32
    %c0_i32_0 = arith.constant 0 : i32
    return %arg0, %c0_i32, %arg1 : i32, i32, i32
  }
  func.func @transform_3(%arg0: i32, %arg1: i32) -> (i32, i32) {
    %c0_i32 = arith.constant 0 : i32
    %c0_i32_0 = arith.constant 0 : i32
    %c0_i32_1 = arith.constant 0 : i32
    return %c0_i32, %c0_i32_0 : i32, i32
  }
  func.func @transform_4(%arg0: i32, %arg1: i32) -> (i32, i32) {
    %c0_i32 = arith.constant 0 : i32
    %c0_i32_0 = arith.constant 0 : i32
    %c0_i32_1 = arith.constant 0 : i32
    return %c0_i32, %c0_i32_0 : i32, i32
  }
  func.func @transform_5(%arg0: i32, %arg1: i32) -> (i32, i32, i32) {
    %c0_i32 = arith.constant 0 : i32
    %c0_i32_0 = arith.constant 0 : i32
    return %arg0, %c0_i32, %arg1 : i32, i32, i32
  }
}

</mosaic_0001>

<bundles_post_ra>
// kernel: triplanar_attention_layer.1
= control target key start
LH: loop header
LB: loop body
LE: loop exit
PB: predicated region body
PF: predicated region fallthrough
CT: control target
= control target key end

     0   :  { %s1034_s18 = smov 0   ;;  %s1036_s19 = smov 0   ;;  %s1141_s0 = inlined_call_operand.vmem [shape: f32[2,4,256], index: 0, kind: input, shape index: {}]   ;;  %s1142_s1 = inlined_call_operand.vmem [shape: f32[2,4,256], index: 1, kind: input, shape index: {}]   ;;  %s1143_s2 = inlined_call_operand.vmem [shape: f32[2,4,256], index: 2, kind: input, shape index: {}]   ;;  %s1144_s3 = inlined_call_operand.vmem [shape: f32[8,4], index: 3, kind: input, shape index: {}]   ;;  %s1145_s4 = inlined_call_operand.vmem [shape: f32[8,4], index: 4, kind: input, shape index: {}]   ;;  %s1146_s5 = inlined_call_operand.vmem [shape: f32[2,8,256], index: 5, kind: output, shape index: {}]  }
   0x1   :  { %s1038_s20 = smov 0  }
   0x2 LB: > { %s27_s21 = sadd.s32 1, %s997_s19  ;;  %p916_p0 = scmp.ge.s32.totalorder %s1001_s20, 1  ;;  %s1001_s20 = sphi %s1038_s20, %s15_s20   ;;  %s997_s19 = sphi %s1036_s19, %s1148_s19   ;;  %s993_s18 = sphi %s1034_s18, %s1147_s18  }
   0x3   : > { %p29_p1 = scmp.ge.s32.totalorder %s27_s21, 2  ;;  %p242_p2 = scmp.lt.s32.totalorder %s1001_s20, 3 }
   0x5   : > { %s1150_s21 = smov (%p29_p1, %s27_s21), 0  ;;  %p243_p3 = pnand %p916_p0, %p242_p2 }
   0x6   : > { %p297_p4 = scmp.lt.s32.totalorder (!%p243_p3), %s993_s18, 1  ;;  %v1003_v0 = vmov (!%p243_p3), 0.0   ;;  %vm347_vm0 = vcmask (!%p243_p3), 1043456   ;;  %v336_v6 = vld [vmem:[%s1144_s3] sm:$0xff] (!%p243_p3)  ;;  %vm343_vm1 = vcmask (!%p243_p3), 31744   ;;  %vm628_vm2 = vcmask (!%p243_p3), 1040384  }
   0x7   : > { %246 = sbr.rel (%p243_p3) target bundleno = 533 (0x215), region = 40  ;;  %416 = vmatprep.mubr.f32.mxu0 (!%p243_p3), %v1003_v0  ;;  %510 = vmatprep.mubr.f32.mxu1 (!%p243_p3), %v1003_v0  ;;  %vm631_vm3 = vcmask (!%p243_p3), 1041408   ;;  %vm634_vm4 = vcmask (!%p243_p3), 1042432  }
   0xe   : > { %s1152_s18 = smov (!%p297_p4, %s993_s18), 1 }
   0xf   : > { %s939_s22 = sshll.u32 %s1152_s18, 3  ;;  %s942_s11 = sshll.u32 %s1152_s18, 4 }
  0x10   : > { %s304_s25 = scalar_lea.vmem %s1141_s0, %s939_s22  ;;  %s314_s28 = scalar_lea.vmem %s1142_s1, %s939_s22 }
  0x11   : > { %v1061_v1 = vld [vmem:[%s304_s25] sm:$0xff]  ;;  %s324_s6 = scalar_lea.vmem %s1143_s2, %s939_s22  ;;  %s334_s14 = scalar_lea.vmem %s1146_s5, %s942_s11 }
  0x12   : > { %v1063_v2 = vld [vmem:[%s314_s28] sm:$0xff]  ;;  %v1070_v3 = vcombine.high %v1061_v1, %v1061_v1 }
  0x13   : > { %v1074_v4 = vcombine.high %v1063_v2, %v1063_v2  ;;  %v1076_v5 = vld [vmem:[%s324_s6] sm:$0xff] }
  0x14   : > { %v1083_v7 = vcombine.high %v1076_v5, %v1076_v5  ;;  %925 = vmatprep.subr.msk.mxu0 %vm347_vm0, %v1070_v3 }
  0x15   : > { %928 = vmatprep.subr.msk.mxu1 %vm347_vm0, %v1074_v4  ;;  %926 = vmatpush1.msk.msra.mxu0 %vm347_vm0, %v1061_v1 }
  0x16   : > { %929 = vmatpush1.msk.msra.mxu1 %vm347_vm0, %v1063_v2  ;;  %927 = vmatmul.mubr.msk.f32.vlgmr.msra.gmra.mrb[0].mxu0 %vm343_vm1, %v336_v6 }
  0x17   : > { %930 = vmatmul.mubr.msk.f32.vlgmr.msra.gmra.mrb[0].mxu1 %vm343_vm1, %v336_v6  ;;  %931 = vmatprep.subr.msk.mxu0 %vm347_vm0, %v1083_v7 }
  0x18   : > { %604 = vmatprep.mubr.f32.mxu0 %v1003_v0  ;;  %932 = vmatpush1.msk.msra.mxu0 %vm347_vm0, %v1076_v5 }
  0x19   : > { %780 = vmatprep.mubr.f32.mxu1 %v1003_v0 }
  0x1a   : > { %933 = vmatmul.mubr.msk.f32.vlgmr.msra.gmra.mrb[2].mxu0 %vm343_vm1, %v336_v6 }
  0xe9   : > { %v418_v8 = vpop.f32.mrb[0].mxu0 }
  0xea   : > { %v512_v9 = vpop.f32.mrb[0].mxu1  ;;  %v424_v10 = vmul.f32 %v418_v8, %v1061_v1  ;;  %v420_v12 = vpop.f32.mrb[1].mxu0 }
  0xeb   : > { %v518_v11 = vmul.f32 %v512_v9, %v1063_v2  ;;  %v514_v13 = vpop.f32.mrb[1].mxu1  ;;  %v425_v14 = vmul.f32 %v420_v12, %v1070_v3 }
  0xec   : > { %v519_v15 = vmul.f32 %v514_v13, %v1074_v4  ;;  %v426_v16 = vsel %vm347_vm0, %v424_v10, 0.0 }
  0xed   : > { %v520_v17 = vsel %vm347_vm0, %v518_v11, 0.0  ;;  %v427_v18 = vrot.slane %v426_v16, 4  ;;  %v433_v20 = vsel %vm347_vm0, %v425_v14, 0.0  ;;  %v606_v22 = vpop.f32.mrb[2].mxu0 }
  0xee   : > { %v521_v19 = vrot.slane %v520_v17, 4  ;;  %v527_v21 = vsel %vm347_vm0, %v519_v15, 0.0  ;;  %v434_v23 = vrot.slane %v433_v20, 4  ;;  %v612_v25 = vmul.f32 %v606_v22, %v1076_v5  ;;  %v608_v26 = vpop.f32.mrb[3].mxu0 }
  0xef   : > { %v528_v24 = vrot.slane %v527_v21, 4  ;;  %v428_v27 = vadd.f32 %v427_v18, %v426_v16  ;;  %v613_v29 = vmul.f32 %v608_v26, %v1083_v7 }
  0xf0   : > { %v522_v28 = vadd.f32 %v521_v19, %v520_v17  ;;  %v435_v30 = vadd.f32 %v434_v23, %v433_v20  ;;  %v614_v32 = vsel %vm347_vm0, %v612_v25, 0.0 }
  0xf1   : > { %v529_v31 = vadd.f32 %v528_v24, %v527_v21  ;;  %v429_v33 = vrot.slane %v428_v27, 2  ;;  %v615_v35 = vrot.slane %v614_v32, 4  ;;  %v621_v36 = vsel %vm347_vm0, %v613_v29, 0.0 }
  0xf2   : > { %v523_v34 = vrot.slane %v522_v28, 2  ;;  %v436_v37 = vrot.slane %v435_v30, 2  ;;  %v622_v39 = vrot.slane %v621_v36, 4 }
  0xf3   : > { %v530_v38 = vrot.slane %v529_v31, 2  ;;  %v430_v40 = vadd.f32 %v429_v33, %v428_v27  ;;  %v616_v42 = vadd.f32 %v615_v35, %v614_v32 }
  0xf4   : > { %v524_v41 = vadd.f32 %v523_v34, %v522_v28  ;;  %v437_v43 = vadd.f32 %v436_v37, %v435_v30  ;;  %v623_v45 = vadd.f32 %v622_v39, %v621_v36 }
  0xf5   : > { %v531_v44 = vadd.f32 %v530_v38, %v529_v31  ;;  %v431_v46 = vrot.slane %v430_v40, 1  ;;  %v617_v48 = vrot.slane %v616_v42, 2 }
  0xf6   : > { %v525_v47 = vrot.slane %v524_v41, 1  ;;  %v438_v49 = vrot.slane %v437_v43, 1  ;;  %v624_v51 = vrot.slane %v623_v45, 2 }
  0xf7   : > { %v532_v50 = vrot.slane %v531_v44, 1  ;;  %v432_v52 = vadd.f32 %v431_v46, %v430_v40  ;;  %v618_v54 = vadd.f32 %v617_v48, %v616_v42  ;;  %v673_v42 = vlaneseq }
  0xf8   : > { %v526_v53 = vadd.f32 %v525_v47, %v524_v41  ;;  %v439_v55 = vadd.f32 %v438_v49, %v437_v43  ;;  %v625_v57 = vadd.f32 %v624_v51, %v623_v45 }
  0xf9   : > { %v533_v56 = vadd.f32 %v532_v50, %v531_v44  ;;  %v619_v59 = vrot.slane %v618_v54, 1  ;;  %v674_v43 = vshrl.u32 %v673_v42, 7 }
  0xfa   : > { %v629_v58 = vsel %vm628_vm2, %v432_v52, %v526_v53  ;;  %v626_v61 = vrot.slane %v625_v57, 1 }
  0xfb   : > { %v630_v60 = vsel %vm628_vm2, %v439_v55, %v533_v56  ;;  %v620_v62 = vadd.f32 %v619_v59, %v618_v54  ;;  %v675_v44 = vsub.s32 0, %v674_v43  ;;  %v685_v45 = vsub.s32 1, %v674_v43 }
  0xfc   : > { %v627_v63 = vadd.f32 %v626_v61, %v625_v57  ;;  %v697_v47 = vsub.s32 2, %v674_v43 }
  0xfd   : > { %v632_v0 = vsel %vm631_vm3, %v629_v58, %v620_v62 }
  0xfe   : > { %v635_v6 = vsel %vm634_vm4, %v632_v0, -inf  ;;  %v633_v8 = vsel %vm631_vm3, %v630_v60, %v627_v63 }
  0xff   : > { %v636_v9 = vrot.slane %v635_v6, 4  ;;  %v642_v10 = vsel %vm634_vm4, %v633_v8, -inf }
 0x100   : > { %v643_v11 = vrot.slane %v642_v10, 4 }
 0x101   : > { %v637_v12 = vmax.f32 %v635_v6, %v636_v9  ;;  %v337_v9 = vld [vmem:[%s1145_s4] sm:$0xff] }
 0x102   : > { %v644_v13 = vmax.f32 %v642_v10, %v643_v11 }
 0x103   : > { %v638_v14 = vrot.slane %v637_v12, 2 }
 0x104   : > { %v645_v15 = vrot.slane %v644_v13, 2 }
 0x105   : > { %v639_v16 = vmax.f32 %v637_v12, %v638_v14 }
 0x106   : > { %v646_v17 = vmax.f32 %v644_v13, %v645_v15 }
 0x107   : > { %v640_v18 = vrot.slane %v639_v16, 1 }
 0x108   : > { %v647_v19 = vrot.slane %v646_v17, 1 }
 0x109   : > { %v641_v20 = vmax.f32 %v639_v16, %v640_v18 }
 0x10a   : > { %v648_v21 = vmax.f32 %v646_v17, %v647_v19 }
 0x10b   : > { %v649_v22 = vsub.f32 %v632_v0, %v641_v20 }
 0x10c   : > { %v650_v23 = vsub.f32 %v633_v8, %v648_v21 }
 0x10d   : > { %v651_v24 = vmul.f32 1.442695, %v649_v22 }
 0x10e   : > { %v653_v25 = vmul.f32 1.442695, %v650_v23 }
 0x10f   : > { %971 = vpow2.f32 %v651_v24 }
 0x110   : > { %973 = vpow2.f32 %v653_v25 }
 0x119   : > { %v972_v26 = vpop.eup %971 }
 0x11a   : > { %v974_v27 = vpop.eup %973  ;;  %v655_v28 = vsel %vm634_vm4, %v972_v26, 0.0 }
 0x11b   : > { %v656_v29 = vrot.slane %v655_v28, 4  ;;  %v662_v30 = vsel %vm634_vm4, %v974_v27, 0.0 }
 0x11c   : > { %v663_v31 = vrot.slane %v662_v30, 4 }
 0x11d   : > { %v657_v32 = vadd.f32 %v656_v29, %v655_v28 }
 0x11e   : > { %v664_v33 = vadd.f32 %v663_v31, %v662_v30 }
 0x11f   : > { %v658_v34 = vrot.slane %v657_v32, 2 }
 0x120   : > { %v665_v35 = vrot.slane %v664_v33, 2 }
 0x121   : > { %v659_v36 = vadd.f32 %v658_v34, %v657_v32 }
 0x122   : > { %v666_v37 = vadd.f32 %v665_v35, %v664_v33 }
 0x123   : > { %v660_v38 = vrot.slane %v659_v36, 1 }
 0x124   : > { %v667_v39 = vrot.slane %v666_v37, 1 }
 0x125   : > { %v661_v40 = vadd.f32 %v660_v38, %v659_v36 }
 0x126   : > { %v668_v41 = vadd.f32 %v667_v39, %v666_v37 }
 0x127   : > { %975 = vrcp.f32 %v661_v40 }
 0x128   : > { %977 = vrcp.f32 %v668_v41 }
 0x131   : > { %v976_v46 = vpop.eup %975 }
 0x132   : > { %v978_v48 = vpop.eup %977  ;;  %v670_v49 = vmul.f32 %v976_v46, %v972_v26 }
 0x133   : > { %v672_v50 = vmul.f32 %v978_v48, %v974_v27 }
 0x134   : > { %v676_v51 = vrot.slane %v670_v49, %v675_v44  ;;  %v686_v52 = vrot.slane %v670_v49, %v685_v45  ;;  %v698_v56 = vrot.slane %v670_v49, %v697_v47 }
 0x135   : > { %v680_v53 = vrot.slane %v672_v50, %v675_v44  ;;  %v690_v54 = vrot.slane %v672_v50, %v685_v45  ;;  %v702_v55 = vrot.slane %v672_v50, %v697_v47 }
 0x136   : > { %v681_v57 = vmul.f32 %v676_v51, %v1061_v1  ;;  %v691_v58 = vmul.f32 %v686_v52, %v1063_v2  ;;  %v703_v0 = vmul.f32 %v698_v56, %v1076_v5 }
 0x137   : > { %v682_v59 = vmul.f32 %v680_v53, %v1070_v3  ;;  %v692_v60 = vmul.f32 %v690_v54, %v1074_v4  ;;  %v704_v63 = vmul.f32 %v702_v55, %v1083_v7 }
 0x138   : > { %v693_v61 = vadd.f32 %v691_v58, %v681_v57 }
 0x139   : > { %v694_v62 = vadd.f32 %v692_v60, %v682_v59 }
 0x13a   : > { %v705_v8 = vadd.f32 %v703_v0, %v693_v61 }
 0x13b   : > { %v706_v6 = vadd.f32 %v704_v63, %v694_v62 }
 0x13d   : > { %934 = vmatprep.subr.msk.mxu1 %vm347_vm0, %v706_v6 }
 0x13e   : > { %935 = vmatpush1.msk.msra.mxu1 %vm347_vm0, %v705_v8 }
 0x13f   : > { %936 = vmatmul.mubr.msk.f32.vlgmr.msra.gmra.mrb[2].mxu1 %vm343_vm1, %v337_v9 }
 0x212   : > { %v782_v1 = vpop.f32.mrb[2].mxu1 }
 0x213   : > { %787 = vst [vmem:[%s334_s14] sm:$0xff] %v782_v1  ;;  %v784_v2 = vpop.f32.mrb[3].mxu1 }
 0x214   : > { %788 = vst [vmem:[%s334_s14 + $0x8] sm:$0xff] %v784_v2 }
 0x215 PF: > { %s15_s20 = sadd.s32 1, %s1001_s20   ;;  %s1147_s18 = smov %s997_s19 }
 0x216   : > { %p12_p5 = scmp.ge.s32.totalorder %s15_s20, 4   ;;  %s1148_s19 = smov %s1150_s21 }
 0x218   :  { %14 = sbr.rel (!%p12_p5) target bundleno = 2 (0x2), region = 76 }

</bundles_post_ra>
